<compile_context>
chip_gen: v7x
topology: tpu7x:2x2x1
jax: 0.10.0
libtpu: 0.0.40
codegen_flags: <defaults>
</compile_context>

<pallas_src>
import jax
import jax.numpy as jnp
from jax.experimental import pallas as pl
from jax.experimental.pallas import tpu as pltpu


_SUBLANE = {4: 8, 2: 16, 1: 32}   # dtype itemsize -> native sublane multiple
_LANE = 128
_VMEM_CAP = 48 << 20              # stay well inside v7x's 64 MiB physical VMEM


def _softprompt_kernel(table_ref, out_ref):
    # table_ref: (1, tile_ld) slice of the flattened embedding table
    #            (embedding(arange(L)) is an identity read of the table).
    # out_ref:   (tb, tile_ld) lane-dense output block; broadcast over rows.
    out_ref[...] = jnp.broadcast_to(table_ref[...], out_ref.shape)


def _round_up(x: int, m: int) -> int:
    return -(-x // m) * m


def _target_settings():
    """Generation-aware knobs: block bytes, output pipeline depth, core count."""
    kind = ""
    num_cores = 1
    try:
        dev = jax.devices()[0]
        kind = (getattr(dev, "device_kind", "") or "").lower()
        num_cores = int(getattr(dev, "num_cores", 1) or 1)
    except Exception:
        pass
    is_v7 = ("v7" in kind) or ("7x" in kind)
    if is_v7:
        # 3.2 TB/s HBM: biggest blocks (step-overhead tax is largest here);
        # default double-buffering keeps 2x16 MiB inside 64 MiB physical VMEM.
        return {"target_block_bytes": 16 << 20, "out_buffers": 2,
                "num_cores": max(num_cores, 2)}
    # v5e / v6e: 8 MiB blocks, 3-deep output pipeline (128 MiB VMEM to spare).
    return {"target_block_bytes": 8 << 20, "out_buffers": 3,
            "num_cores": max(num_cores, 1)}


def _pick_tiles(batch_size, ld, itemsize, *, target_block_bytes, num_cores):
    """Choose (batch_tile, ld_tile) giving ~target-sized, lane-dense blocks."""
    sub = _SUBLANE.get(itemsize, 8)
    row_bytes = ld * itemsize
    total_bytes = batch_size * row_bytes

    if total_bytes <= target_block_bytes:
        tb, tile_ld = batch_size, ld
    elif sub * row_bytes <= target_block_bytes:
        # Whole rows fit comfortably: tile the batch axis only.
        tile_ld = ld
        tb = min(batch_size,
                 max(sub, (target_block_bytes // row_bytes) // sub * sub))
    else:
        # Even a sublane-group of rows exceeds the target: tile L*D as well
        # (keeps blocks lane-dense multiples of 128 for any (L, D)).
        tb = sub if batch_size >= sub else batch_size
        tile_ld = (target_block_bytes // (tb * itemsize)) // _LANE * _LANE
        tile_ld = min(max(tile_ld, _LANE), ld)

    # Guarantee >= num_cores blocks so every TensorCore (2 on v7x) drives its
    # own writeback stream; only split if the batch axis can stay sublane-clean.
    if num_cores > 1 and batch_size >= num_cores * sub:
        nblocks = pl.cdiv(ld, tile_ld) * pl.cdiv(batch_size, tb)
        if nblocks < num_cores:
            tb = _round_up(pl.cdiv(batch_size, num_cores), sub)
    return tb, tile_ld


def _soft_prompt_pallas(prompt_weight, batch_size, *, batch_tile=None, ld_tile=None):
    """Pallas path: materialize the (B, L, D) broadcast of the table in HBM."""
    L, D = prompt_weight.shape
    dtype = prompt_weight.dtype
    itemsize = jnp.dtype(dtype).itemsize
    LD = L * D

    cfg = _target_settings()
    tb, tile_ld = _pick_tiles(
        batch_size, LD, itemsize,
        target_block_bytes=cfg["target_block_bytes"], num_cores=cfg["num_cores"])
    if batch_tile is not None:
        tb = batch_tile
    if ld_tile is not None:
        tile_ld = ld_tile

    # (8, 128) BlockSpec rule: second-last dim multiple of 8 (or full extent),
    # last dim multiple of 128 (or full extent).
    assert tb == batch_size or tb % 8 == 0, (tb, batch_size)
    assert tile_ld == LD or tile_ld % _LANE == 0, (tile_ld, LD)
    assert 0 < tb <= batch_size and 0 < tile_ld <= LD

    # LD tiles on the OUTER grid axis so the (j-indexed) table block stays
    # resident across the inner batch sweep (table read ~once, not per step).
    grid = (pl.cdiv(LD, tile_ld), pl.cdiv(batch_size, tb))

    out_block_bytes = tb * tile_ld * itemsize
    table_block_bytes = tile_ld * itemsize
    out_buffers = cfg["out_buffers"]

    # Actual VMEM requirement (+ slack); no artificial floor, so headroom
    # remains when this kernel is composed into a larger program.
    vmem_need = out_buffers * out_block_bytes + 2 * table_block_bytes + (4 << 20)
    assert vmem_need <= _VMEM_CAP, (
        f"tile choice needs {vmem_need >> 20} MiB VMEM (> {_VMEM_CAP >> 20} MiB); "
        f"retile (tb={tb}, tile_ld={tile_ld})")
    vmem_limit = int(max(8 << 20, vmem_need))

    table2d = prompt_weight.reshape(1, LD)           # lane-dense presentation
    bytes_accessed = LD * itemsize + batch_size * LD * itemsize

    def build(buffers):
        out_kwargs = {}
        if buffers is not None and buffers != 2:     # 2 is the default depth
            out_kwargs["pipeline_mode"] = pl.Buffered(buffers)
        return pl.pallas_call(
            _softprompt_kernel,
            out_shape=jax.ShapeDtypeStruct((batch_size, LD), dtype),
            grid_spec=pltpu.PrefetchScalarGridSpec(
                num_scalar_prefetch=0,
                grid=grid,
                in_specs=[
                    # Table slice depends only on the outer LD-tile index ->
                    # resident across the inner batch sweep.
                    pl.BlockSpec((1, tile_ld), lambda j, b: (0, j)),
                ],
                out_specs=pl.BlockSpec((tb, tile_ld), lambda j, b: (b, j),
                                       **out_kwargs),
            ),
            compiler_params=pltpu.CompilerParams(
                dimension_semantics=("parallel", "parallel"),
                vmem_limit_bytes=vmem_limit,
            ),
            cost_estimate=pl.CostEstimate(
                flops=0, transcendentals=0, bytes_accessed=bytes_accessed),
        )

    try:
        out2d = build(out_buffers)(table2d)
    except Exception:
        # If this Pallas/Mosaic build rejects the pipeline_mode knob, fall back
        # to the default double-buffered output (identical semantics).
        out2d = build(None)(table2d)

    return out2d.reshape(batch_size, L, D)


def soft_prompt_forward(prompt_weight, batch_size, *, use_pallas=False,
                        batch_tile=None, ld_tile=None):
    """Equivalent of SoftPrompt.forward(batch_size) -> (B, L, D).

    Default path is jnp.broadcast_to: a consumer-fused broadcast never
    materializes the (B, L, D) tensor in HBM, which beats any copy kernel
    (the kernel can at best hit the HBM write roofline).  Pass use_pallas=True
    only when a materialized replica is genuinely required.
    """
    L, D = prompt_weight.shape
    if not use_pallas:
        return jnp.broadcast_to(prompt_weight[None, :, :], (batch_size, L, D))
    return _soft_prompt_pallas(prompt_weight, batch_size,
                               batch_tile=batch_tile, ld_tile=ld_tile)


if __name__ == "__main__":
    # Deterministic synthetic parameters (nn.Embedding(prompt_length, embedding_dim)).
    prompt_length = 8
    embedding_dim = 32

    key = jax.random.PRNGKey(0)
    prompt_weight = jax.random.normal(
        key, (prompt_length, embedding_dim), dtype=jnp.float32)

    def ref(w, b):
        return jnp.broadcast_to(w[None, :, :], (b,) + w.shape)

    # 1) Single-block path (B=2 -> grid=(1,1), tb == full batch).
    out2 = jax.block_until_ready(_soft_prompt_pallas(prompt_weight, 2))
    assert out2.shape == (2, prompt_length, embedding_dim), out2.shape
    assert out2.dtype == jnp.float32, out2.dtype
    assert jnp.array_equal(out2, ref(prompt_weight, 2)), "mismatch (B=2)"

    # 2) Batch-tiled multi-step path (B=16, tb=8 -> grid=(1,2)).
    out16 = jax.block_until_ready(_soft_prompt_pallas(prompt_weight, 16, batch_tile=8))
    assert jnp.array_equal(out16, ref(prompt_weight, 16)), "mismatch (B=16)"

    # 3) 2-D grid path: batch AND L*D tiling (tb=8, tile_ld=128 -> grid=(2,2)).
    out16b = jax.block_until_ready(
        _soft_prompt_pallas(prompt_weight, 16, batch_tile=8, ld_tile=128))
    assert jnp.array_equal(out16b, ref(prompt_weight, 16)), "mismatch (B=16, LD-tiled)"

    # 4) bf16 table (exercises the dtype-native sublane tile selection).
    w_bf16 = prompt_weight.astype(jnp.bfloat16)
    out_bf16 = jax.block_until_ready(_soft_prompt_pallas(w_bf16, 16))
    assert out_bf16.dtype == jnp.bfloat16, out_bf16.dtype
    assert jnp.array_equal(out_bf16, ref(w_bf16, 16)), "mismatch (bf16)"

    # 5) Default dispatch: fused jnp.broadcast_to (preferred when the consumer
    #    can fuse the broadcast — avoids materializing B*L*D entirely).
    out_auto = jax.block_until_ready(soft_prompt_forward(prompt_weight, 16))
    assert jnp.array_equal(out_auto, ref(prompt_weight, 16)), "dispatch mismatch"

    print("KERNEL_OK")
</pallas_src>

<mosaic_0001>
module attributes {stable_mosaic.version = 11 : i64} {
  func.func @_softprompt_kernel(%arg0: i32, %arg1: i32, %arg2: memref<1x256xf32, #tpu.memory_space<vmem>>, %arg3: memref<2x256xf32, #tpu.memory_space<vmem>>) attributes {dimension_semantics = [#tpu.dimension_semantics<parallel>, #tpu.dimension_semantics<parallel>], iteration_bounds = array<i64: 1, 1>, scalar_prefetch = 0 : i64, scratch_operands = 0 : i64, tpu.core_type = #tpu.core_type<tc>, window_params = [{transform_indices = @transform_0, window_bounds = array<i64: 1, 256>}, {transform_indices = @transform_1, window_bounds = array<i64: 2, 256>}]} {
    %c0 = arith.constant 0 : index
    %c0_0 = arith.constant 0 : index
    %0 = vector.load %arg2[%c0, %c0_0] : memref<1x256xf32, #tpu.memory_space<vmem>>, vector<1x256xf32>
    %1 = vector.shape_cast %0 : vector<1x256xf32> to vector<1x256xf32>
    %2 = vector.broadcast %1 : vector<1x256xf32> to vector<2x256xf32>
    %c0_1 = arith.constant 0 : index
    %c0_2 = arith.constant 0 : index
    %3 = vector.load %arg3[%c0_1, %c0_2] : memref<2x256xf32, #tpu.memory_space<vmem>>, vector<2x256xf32>
    tpu.vector_store %arg3[%c0_1, %c0_2], %2 {strides = array<i32>} : memref<2x256xf32, #tpu.memory_space<vmem>>, vector<2x256xf32>,
    return
  }
  func.func @transform_0(%arg0: i32, %arg1: i32) -> (i32, i32) {
    %c0_i32 = arith.constant 0 : i32
    %c0_i32_0 = arith.constant 0 : i32
    return %c0_i32, %arg0 : i32, i32
  }
  func.func @transform_1(%arg0: i32, %arg1: i32) -> (i32, i32) {
    %c0_i32 = arith.constant 0 : i32
    return %arg1, %arg0 : i32, i32
  }
}

</mosaic_0001>

<bundles_post_ra>
// kernel: tpu_custom_call.1
= control target key start
LH: loop header
LB: loop body
LE: loop exit
PB: predicated region body
PF: predicated region fallthrough
CT: control target
= control target key end

     0   :  { %6 = vsyncpa [#allocation3], 0  ;;  %s143_s0 = inlined_call_operand.hbm [shape: f32[1,256], index: 0, kind: input, shape index: {}]   ;;  %s144_s1 = inlined_call_operand.hbm [shape: f32[2,256], index: 1, kind: output, shape index: {}]  }
   0x1   :  { %7 = vsyncpa [#allocation4], 0  ;;  %s107_s6 = smov [#allocation2]   ;;  %s59_s10 = scalar_lea.hbm %s143_s0, 32 }
   0x2   :  { %s14_s7 = sshll.u32 %s107_s6, 4  ;;  %p60_p0 = scmp.ne.s32.totalorder %s143_s0, %s59_s10  ;;  %s15_s7 = int_to_ptr.vmem [resolvable:$true] %s14_s7 }
   0x3   :  { %p63_p1 = scmp.lt.u32.totalorder %s59_s10, %s143_s0 }
   0x5   :  { %p65_p2 = pnand %p63_p1, %p60_p0 }
   0x7   :  { %68 = shalt.err (!%p65_p2)
}
   0x8   :  { %s69_s15 = scalar_lea.vmem %s15_s7, 32  ;;  %p74_p4 = scmp.lt.s32.totalorder %s15_s7, %s15_s7 }
   0x9   :  { %p70_p3 = scmp.ne.s32.totalorder %s15_s7, %s69_s15  ;;  %p75_p5 = scmp.lt.s32.totalorder %s69_s15, %s69_s15 }
   0xb   :  { %p76_p6 = por %p75_p5, %p74_p4 }
   0xd   :  { %p77_p7 = pnand %p76_p6, %p70_p3 }
   0xf   :  { %80 = shalt.err (!%p77_p7)
}
  0x10   :  { %17 = dma.hbm_to_vmem [thread:$0]  %s143_s0, 32, %s15_s7, [#allocation3]  }
  0x11   :  { %103 = dma.done.wait [#allocation3], 32  }
  0x12   :  { %104 = vsyncadd [#allocation3], 4294967264  ;;  %v23_v0 = vlaneseq  ;;  %v21_v4 = vld [vmem:[#allocation2] sm:$0x3]  ;;  %s108_s18 = smov [#allocation5]  }
  0x13   :  { %s47_s19 = sshll.u32 %s108_s18, 4  ;;  %s48_s19 = int_to_ptr.vmem [resolvable:$true] %s47_s19 }
  0x14   :  { %v24_v1 = vshrl.u32 %v23_v0, 7  ;;  %s81_s20 = scalar_lea.vmem %s48_s19, 64  ;;  %p86_p9 = scmp.lt.s32.totalorder %s48_s19, %s48_s19 }
  0x15   :  { %p82_p8 = scmp.ne.s32.totalorder %s48_s19, %s81_s20  ;;  %p87_p10 = scmp.lt.s32.totalorder %s81_s20, %s81_s20 }
  0x16   :  { %v25_v2 = vsub.s32 0, %v24_v1  ;;  %v29_v3 = vsub.s32 1, %v24_v1 }
  0x17   :  { %p88_p11 = por %p87_p10, %p86_p9 }
  0x18   :  { %v26_v5 = vrot.slane %v21_v4, %v25_v2  ;;  %v30_v6 = vrot.slane %v21_v4, %v29_v3 }
  0x19   :  { %p89_p12 = pnand %p88_p11, %p82_p8 }
  0x1a   :  { %v31_v7 = vcombine.low %v26_v5, %v30_v6 }
  0x1c   :  { %56 = vst.sshfl [vmem:[#allocation5] sm:$0x33 pattern:$0x76325410] %v31_v7 }
  0x1d   :  { %92 = shalt.err (!%p89_p12)
}
  0x1e   :  { %s93_s22 = scalar_lea.hbm %s144_s1, 64 }
  0x1f   :  { %p94_p13 = scmp.ne.s32.totalorder %s144_s1, %s93_s22  ;;  %p97_p0 = scmp.lt.u32.totalorder %s93_s22, %s144_s1 }
  0x21   :  { %p99_p1 = pnand %p97_p0, %p94_p13 }
  0x23   :  { %102 = shalt.err (!%p99_p1)
}
  0x24   :  { %50 = dma.vmem_to_hbm [thread:$0]  %s48_s19, 64, %s144_s1, [#allocation4]  }
  0x25   :  { %105 = dma.done.wait [#allocation4], 64  }
  0x26   :  { %106 = vsyncadd [#allocation4], 4294967232 }
  0x27   :  { %54 = vsyncpa [#allocation3], 1 }
  0x28   :  { %55 = vsyncpa [#allocation4], 1 }

</bundles_post_ra>
